<compile_context>
chip_gen: v7x
topology: tpu7x:2x2x1
jax: 0.10.0
libtpu: 0.0.40
codegen_flags: <defaults>
</compile_context>

<pallas_src>
import functools

import jax
import jax.numpy as jnp
from jax.experimental import pallas as pl
from jax.experimental.pallas import tpu as pltpu


# ----------------------------------------------------------------------------- helpers
def _cdiv(a, b):
    return -(-a // b)


def _round_up(v, m):
    return _cdiv(v, m) * m


def _balanced_tile(size, max_tile, mult):
    """Split `size` into equal-ish tiles (<= max_tile, multiple of `mult`).

    Returns (tile, padded_size, num_tiles) with padded_size == tile * num_tiles.
    """
    size_r = _round_up(max(size, 1), mult)
    n_tiles = _cdiv(size_r, max(max_tile, mult))
    tile = _round_up(_cdiv(size_r, n_tiles), mult)
    return tile, tile * n_tiles, n_tiles


def _default_tiles():
    """Generation-specific prefill tile presets (tm, tn, tk).

    v6e: crossover ~670 FLOP/B -> big tm/tn (AI ~512+);   ~20 MiB VMEM incl. f32 acc.
    v7x: crossover ~310 FLOP/B, but only 64 MiB VMEM   -> tm=tn=768 (~13 MiB).
    v5e: crossover ~240 FLOP/B, 16 MiB scoped default  -> tm=tn=512 (~7 MiB even in f32).
    """
    try:
        kind = jax.devices()[0].device_kind.lower()
    except Exception:  # pragma: no cover - defensive
        kind = ""
    if "v6" in kind:
        return (1024, 1024, 512)
    if "v7" in kind:
        return (768, 768, 512)
    return (512, 512, 512)


# ------------------------------------------------------------------------------ kernel
def _row_parallel_linear_kernel(x_ref, w_ref, b_ref, o_ref, acc_ref):
    k = pl.program_id(2)

    @pl.when(k == 0)
    def _():
        acc_ref[...] = jnp.zeros_like(acc_ref)

    # w_ref is [N_tile, K_tile] (native PyTorch layout); contract dim 1 of both
    # operands, i.e. X @ W^T.  Accumulation over the K grid axis plays the role of
    # reduce_from_model_parallel_region (the all-reduce sum over partitions).
    acc_ref[...] += jax.lax.dot_general(
        x_ref[...],
        w_ref[...],
        dimension_numbers=(((1,), (1,)), ((), ())),
        preferred_element_type=jnp.float32,
    )

    @pl.when(k == pl.num_programs(2) - 1)
    def _():
        # Bias is not parallelized: added once, after the reduction, in f32.
        o_ref[...] = (acc_ref[...] + b_ref[...]).astype(o_ref.dtype)


# ----------------------------------------------------------------------------- wrapper
@functools.partial(
    jax.jit,
    static_argnames=("out_features", "tm", "tn", "tk", "weight_buffers",
                     "vmem_limit_bytes"),
)
def _row_parallel_linear_impl(x, weight, bias, *, out_features, tm, tn, tk,
                              weight_buffers, vmem_limit_bytes):
    *lead, in_features = x.shape
    m = 1
    for d in lead:
        m *= d

    # MXU compute dtype = the narrower of (x, weight).  Cast X here once (halves X HBM
    # traffic & VMEM when streaming bf16 weights) instead of per-tile in the kernel.
    x_dt, w_dt = jnp.dtype(x.dtype), jnp.dtype(weight.dtype)
    compute_dt = x_dt if x_dt.itemsize <= w_dt.itemsize else w_dt
    out_dt = x_dt  # output follows the activation dtype

    row_mult = {4: 8, 2: 16, 1: 32}.get(compute_dt.itemsize, 8)

    tm_eff, m_pad, m_tiles = _balanced_tile(m, tm, row_mult)
    tn_eff, n_pad, n_tiles = _balanced_tile(out_features, tn, 128)
    tk_eff, k_pad, k_tiles = _balanced_tile(in_features, tk, 128)

    # Megacore (v7x) hint: keep >=2 steps along the parallel (i, j) grid axes for
    # decode-shaped calls.  Split only when n_pad is unchanged so a weight pre-padded
    # with prepare_row_parallel_weight stays valid; harmless on single-TC chips.
    if m_tiles == 1 and n_tiles == 1 and tn_eff >= 256 and tn_eff % 256 == 0:
        tn_eff //= 2
        n_tiles = 2

    x2d = x.reshape(m, in_features).astype(compute_dt)
    if (m_pad, k_pad) != (m, in_features):
        x2d = jnp.pad(x2d, ((0, m_pad - m), (0, k_pad - in_features)))

    # Weight: zero-copy when already padded/cast at load time via
    # prepare_row_parallel_weight(); otherwise pad/cast here (trace-time no-op for
    # tile-aligned shapes, so the common case never copies the weight inside jit).
    w2d = weight.astype(compute_dt)
    if w2d.shape != (n_pad, k_pad):
        wn, wk = w2d.shape
        if wn > n_pad or wk > k_pad:
            raise ValueError(
                "pre-padded weight was prepared with different tn/tk than this call: "
                f"got {w2d.shape}, expected at most {(n_pad, k_pad)}")
        w2d = jnp.pad(w2d, ((0, n_pad - wn), (0, k_pad - wk)))

    if bias is None:
        b2d = jnp.zeros((1, n_pad), jnp.float32)
    else:
        b2d = bias.astype(jnp.float32)
        if b2d.shape[0] != n_pad:
            b2d = jnp.pad(b2d, (0, n_pad - b2d.shape[0]))
        b2d = b2d.reshape(1, n_pad)

    grid = (m_tiles, n_tiles, k_tiles)

    w_spec_kwargs = {}
    if weight_buffers is not None and weight_buffers != 2:
        # Deeper prefetch on the weight stream (decode is weight-BW bound).
        w_spec_kwargs["pipeline_mode"] = pl.Buffered(weight_buffers)

    itemsize = compute_dt.itemsize
    cost = pl.CostEstimate(
        flops=2 * m_pad * n_pad * k_pad,
        transcendentals=0,
        bytes_accessed=(m_pad * k_pad * itemsize                 # X
                        + n_pad * k_pad * itemsize               # W
                        + n_pad * 4                              # bias
                        + m_pad * n_pad * jnp.dtype(out_dt).itemsize),  # Y
    )

    out2d = pl.pallas_call(
        _row_parallel_linear_kernel,
        out_shape=jax.ShapeDtypeStruct((m_pad, n_pad), out_dt),
        grid_spec=pltpu.PrefetchScalarGridSpec(
            num_scalar_prefetch=0,
            grid=grid,
            in_specs=[
                pl.BlockSpec((tm_eff, tk_eff), lambda i, j, k: (i, k)),   # X  [M,K]
                pl.BlockSpec((tn_eff, tk_eff), lambda i, j, k: (j, k),    # W  [N,K]
                             **w_spec_kwargs),
                pl.BlockSpec((1, tn_eff), lambda i, j, k: (0, j)),        # bias
            ],
            out_specs=pl.BlockSpec((tm_eff, tn_eff), lambda i, j, k: (i, j)),
            scratch_shapes=[pltpu.VMEM((tm_eff, tn_eff), jnp.float32)],
        ),
        compiler_params=pltpu.CompilerParams(
            # M/N axes parallel (megacore on v7x), K reduction innermost/arbitrary.
            dimension_semantics=("parallel", "parallel", "arbitrary"),
            vmem_limit_bytes=vmem_limit_bytes,
        ),
        cost_estimate=cost,
    )(x2d, w2d, b2d)

    out2d = out2d[:m, :out_features]
    return out2d.reshape(*lead, out_features)


def row_parallel_linear(x, weight, bias=None, *, out_features=None,
                        tm=None, tn=None, tk=None,
                        weight_buffers=None, vmem_limit_bytes=None):
    """Y = x @ weight.T + bias  (RowParallelLinear forward, single-chip).

    x:       (..., in_features)            activations (f32 or bf16)
    weight:  (out_features, in_features)   PyTorch layout; may be bf16 and/or pre-padded
                                           with prepare_row_parallel_weight().
    bias:    (out_features,) or None       not parallelized; added after the reduction.
    out_features: required (static) when passing a pre-padded weight.
    """
    if tm is None or tn is None or tk is None:
        d_tm, d_tn, d_tk = _default_tiles()
        tm = d_tm if tm is None else tm
        tn = d_tn if tn is None else tn
        tk = d_tk if tk is None else tk
    if out_features is None:
        out_features = int(weight.shape[0])
    return _row_parallel_linear_impl(
        x, weight, bias,
        out_features=out_features, tm=tm, tn=tn, tk=tk,
        weight_buffers=weight_buffers, vmem_limit_bytes=vmem_limit_bytes)


def prepare_row_parallel_weight(weight, *, tn=None, tk=None, dtype=None):
    """Pad (and optionally cast, e.g. to bf16 for streaming) the [out, in] weight ONCE
    at model-load time, outside jit, so the per-call path never copies the weight.
    Use the same tn/tk as the forward call and pass the true `out_features` there.
    """
    if tn is None or tk is None:
        _, d_tn, d_tk = _default_tiles()
        tn = d_tn if tn is None else tn
        tk = d_tk if tk is None else tk
    n, k = weight.shape
    _, n_pad, _ = _balanced_tile(n, tn, 128)
    _, k_pad, _ = _balanced_tile(k, tk, 128)
    w = weight if dtype is None else weight.astype(dtype)
    if (n_pad, k_pad) != (n, k):
        w = jnp.pad(w, ((0, n_pad - n), (0, k_pad - k)))
    return w


def xavier_normal(key, shape, dtype=jnp.float32):
    fan_out, fan_in = shape  # (out_features, in_features)
    std = (2.0 / (fan_in + fan_out)) ** 0.5
    return std * jax.random.normal(key, shape, dtype)


# -------------------------------------------------------------------------------- main
if __name__ == "__main__":
    # Module config (synthetic, small): simulate world_size = 2 partitions.
    batch, seq = 2, 4
    in_features, out_features = 256, 128
    world_size = 2
    # Sharding constant only; the kernel's K tile is an MXU/VMEM knob and is NOT tied
    # to this value (the K reduction is associative).
    input_size_per_partition = in_features // world_size

    key = jax.random.PRNGKey(0)
    kx, kw = jax.random.split(key)

    x = jax.random.normal(kx, (batch, seq, in_features), dtype=jnp.float32)
    weight = xavier_normal(kw, (out_features, in_features))  # PyTorch (out, in) layout
    bias = jnp.zeros((out_features,), dtype=jnp.float32)     # bias.zero_() in __init__

    # ---- 1) f32 path: correctness check --------------------------------------------
    out = row_parallel_linear(x, weight, bias)
    jax.block_until_ready(out)
    ref = jnp.einsum("bsi,oi->bso", x, weight) + bias
    assert out.shape == (batch, seq, out_features)
    assert jnp.allclose(out, ref, atol=1e-3, rtol=1e-3)

    # ---- 2) bf16 weight streaming: cast/pad hoisted out of the jitted path ----------
    w_bf16 = prepare_row_parallel_weight(weight, dtype=jnp.bfloat16)   # once, at "load"
    out_bf16 = row_parallel_linear(x, w_bf16, bias, out_features=out_features)
    jax.block_until_ready(out_bf16)
    ref_bf16 = (jnp.einsum("bsi,oi->bso",
                           x.astype(jnp.bfloat16).astype(jnp.float32),
                           w_bf16[:out_features].astype(jnp.float32)) + bias)
    assert jnp.allclose(out_bf16, ref_bf16, atol=2e-2, rtol=2e-2)

    # ---- 3) ragged shapes: in-jit pad path AND pre-padded-weight path ----------------
    m2, in2, out2 = 6, 200, 72
    x_r = jax.random.normal(jax.random.PRNGKey(1), (m2, in2), dtype=jnp.float32)
    w_r = xavier_normal(jax.random.PRNGKey(2), (out2, in2))
    b_r = jax.random.normal(jax.random.PRNGKey(3), (out2,), dtype=jnp.float32)
    ref_r = x_r @ w_r.T + b_r

    out_r = row_parallel_linear(x_r, w_r, b_r)                         # pads inside jit
    jax.block_until_ready(out_r)
    assert out_r.shape == (m2, out2)
    assert jnp.allclose(out_r, ref_r, atol=1e-3, rtol=1e-3)

    w_r_prep = prepare_row_parallel_weight(w_r)                        # padded at "load"
    out_rp = row_parallel_linear(x_r, w_r_prep, b_r, out_features=out2)
    jax.block_until_ready(out_rp)
    assert jnp.allclose(out_rp, ref_r, atol=1e-3, rtol=1e-3)

    # ---- 4) decode shape (m=1): exercises balanced tiles + megacore N split ---------
    in3, out3 = 384, 512
    x_d = jax.random.normal(jax.random.PRNGKey(4), (1, in3), dtype=jnp.float32)
    w_d = xavier_normal(jax.random.PRNGKey(5), (out3, in3))
    b_d = jax.random.normal(jax.random.PRNGKey(6), (out3,), dtype=jnp.float32)
    out_d = row_parallel_linear(x_d, w_d, b_d)
    jax.block_until_ready(out_d)
    ref_d = x_d @ w_d.T + b_d
    assert out_d.shape == (1, out3)
    assert jnp.allclose(out_d, ref_d, atol=1e-3, rtol=1e-3)

    # TODO(synk): the actual cross-device all-reduce (reduce_from_model_parallel_region)
    # is realized here as the single-chip K-axis accumulation; a multi-chip version
    # would add a make_async_remote_copy ring with collective_id (and, on v7x, fp8
    # rather than int8 if weight quantization is added for decode streaming).
    print("KERNEL_OK")
</pallas_src>

<mosaic_0001>
module attributes {stable_mosaic.version = 11 : i64} {
  func.func @_row_parallel_linear_kernel(%arg0: i32, %arg1: i32, %arg2: i32, %arg3: memref<8x256xf32, #tpu.memory_space<vmem>>, %arg4: memref<128x256xf32, #tpu.memory_space<vmem>>, %arg5: memref<1x128xf32, #tpu.memory_space<vmem>>, %arg6: memref<8x128xf32, #tpu.memory_space<vmem>>, %arg7: memref<8x128xf32, #tpu.memory_space<vmem>>) attributes {dimension_semantics = [#tpu.dimension_semantics<parallel>, #tpu.dimension_semantics<parallel>, #tpu.dimension_semantics<arbitrary>], iteration_bounds = array<i64: 1, 1, 1>, scalar_prefetch = 0 : i64, scratch_operands = 1 : i64, tpu.core_type = #tpu.core_type<tc>, window_params = [{transform_indices = @transform_0, window_bounds = array<i64: 8, 256>}, {transform_indices = @transform_1, window_bounds = array<i64: 128, 256>}, {transform_indices = @transform_2, window_bounds = array<i64: 1, 128>}, {transform_indices = @transform_3, window_bounds = array<i64: 8, 128>}]} {
    %c0_i32 = arith.constant 0 : i32
    %0 = arith.cmpi eq, %arg2, %c0_i32 : i32
    %1 = arith.extui %0 : i1 to i32
    %c0_i32_0 = arith.constant 0 : i32
    %2 = arith.cmpi ne, %1, %c0_i32_0 : i32
    scf.if %2 {
      %cst_10 = arith.constant 0.000000e+00 : f32
      %12 = vector.broadcast %cst_10 : f32 to vector<8x128xf32>
      %c0_11 = arith.constant 0 : index
      %c0_12 = arith.constant 0 : index
      %13 = vector.load %arg7[%c0_11, %c0_12] : memref<8x128xf32, #tpu.memory_space<vmem>>, vector<8x128xf32>
      tpu.vector_store %arg7[%c0_11, %c0_12], %12 {strides = array<i32>} : memref<8x128xf32, #tpu.memory_space<vmem>>, vector<8x128xf32>,
    } else {
    }
    %c0 = arith.constant 0 : index
    %c0_1 = arith.constant 0 : index
    %3 = vector.load %arg7[%c0, %c0_1] : memref<8x128xf32, #tpu.memory_space<vmem>>, vector<8x128xf32>
    %c0_2 = arith.constant 0 : index
    %c0_3 = arith.constant 0 : index
    %4 = vector.load %arg3[%c0_2, %c0_3] : memref<8x256xf32, #tpu.memory_space<vmem>>, vector<8x256xf32>
    %c0_4 = arith.constant 0 : index
    %c0_5 = arith.constant 0 : index
    %5 = vector.load %arg4[%c0_4, %c0_5] : memref<128x256xf32, #tpu.memory_space<vmem>>, vector<128x256xf32>
    %cst = arith.constant dense<0.000000e+00> : vector<8x128xf32>
    %6 = tpu.matmul %4, %5, %cst {dimension_numbers = #tpu.dot_dimension_numbers<[1], [1], [0], [0], [0, 0, 1, 0], [], []>} : vector<8x256xf32>, vector<128x256xf32>, vector<8x128xf32> -> vector<8x128xf32>
    %7 = arith.addf %3, %6 : vector<8x128xf32>
    %c0_6 = arith.constant 0 : index
    %c0_7 = arith.constant 0 : index
    %8 = vector.load %arg7[%c0_6, %c0_7] : memref<8x128xf32, #tpu.memory_space<vmem>>, vector<8x128xf32>
    tpu.vector_store %arg7[%c0_6, %c0_7], %7 {strides = array<i32>} : memref<8x128xf32, #tpu.memory_space<vmem>>, vector<8x128xf32>,
    %c0_i32_8 = arith.constant 0 : i32
    %9 = arith.cmpi eq, %arg2, %c0_i32_8 : i32
    %10 = arith.extui %9 : i1 to i32
    %c0_i32_9 = arith.constant 0 : i32
    %11 = arith.cmpi ne, %10, %c0_i32_9 : i32
    scf.if %11 {
      %c0_10 = arith.constant 0 : index
      %c0_11 = arith.constant 0 : index
      %12 = vector.load %arg7[%c0_10, %c0_11] : memref<8x128xf32, #tpu.memory_space<vmem>>, vector<8x128xf32>
      %c0_12 = arith.constant 0 : index
      %c0_13 = arith.constant 0 : index
      %13 = vector.load %arg5[%c0_12, %c0_13] : memref<1x128xf32, #tpu.memory_space<vmem>>, vector<1x128xf32>
      %14 = vector.broadcast %13 : vector<1x128xf32> to vector<8x128xf32>
      %15 = arith.addf %12, %14 : vector<8x128xf32>
      %c0_14 = arith.constant 0 : index
      %c0_15 = arith.constant 0 : index
      %16 = vector.load %arg6[%c0_14, %c0_15] : memref<8x128xf32, #tpu.memory_space<vmem>>, vector<8x128xf32>
      tpu.vector_store %arg6[%c0_14, %c0_15], %15 {strides = array<i32>} : memref<8x128xf32, #tpu.memory_space<vmem>>, vector<8x128xf32>,
    } else {
    }
    return
  }
  func.func @transform_0(%arg0: i32, %arg1: i32, %arg2: i32) -> (i32, i32) {
    %c0_i32 = arith.constant 0 : i32
    return %arg0, %arg2 : i32, i32
  }
  func.func @transform_1(%arg0: i32, %arg1: i32, %arg2: i32) -> (i32, i32) {
    %c0_i32 = arith.constant 0 : i32
    return %arg1, %arg2 : i32, i32
  }
  func.func @transform_2(%arg0: i32, %arg1: i32, %arg2: i32) -> (i32, i32) {
    %c0_i32 = arith.constant 0 : i32
    %c0_i32_0 = arith.constant 0 : i32
    return %c0_i32, %arg1 : i32, i32
  }
  func.func @transform_3(%arg0: i32, %arg1: i32, %arg2: i32) -> (i32, i32) {
    %c0_i32 = arith.constant 0 : i32
    return %arg0, %arg1 : i32, i32
  }
}

</mosaic_0001>

<bundles_post_ra>
// kernel: _row_parallel_linear_impl.1
= control target key start
LH: loop header
LB: loop body
LE: loop exit
PB: predicated region body
PF: predicated region fallthrough
CT: control target
= control target key end

     0   :  { %8 = vsyncpa [#allocation4], 0  ;;  %s311_s0 = inlined_call_operand.vmem [shape: f32[8,256], index: 0, kind: input, shape index: {}]   ;;  %s312_s1 = inlined_call_operand.hbm [shape: f32[128,256], index: 1, kind: input, shape index: {}]   ;;  %s313_s2 = inlined_call_operand.vmem [shape: f32[1,128], index: 2, kind: input, shape index: {}]   ;;  %s314_s3 = inlined_call_operand.hbm [shape: f32[8,128], index: 3, kind: output, shape index: {}]  }
   0x1   :  { %9 = vsyncpa [#allocation5], 0  ;;  %s254_s12 = smov [#allocation3]   ;;  %s206_s16 = scalar_lea.hbm %s312_s1, 4096 }
   0x2   :  { %s17_s13 = sshll.u32 %s254_s12, 4  ;;  %p207_p0 = scmp.ne.s32.totalorder %s312_s1, %s206_s16  ;;  %s18_s13 = int_to_ptr.vmem [resolvable:$true] %s17_s13 }
   0x3   :  { %p210_p1 = scmp.lt.u32.totalorder %s206_s16, %s312_s1 }
   0x5   :  { %p212_p2 = pnand %p210_p1, %p207_p0 }
   0x7   :  { %215 = shalt.err (!%p212_p2)
}
   0x8   :  { %s216_s21 = scalar_lea.vmem %s18_s13, 4096  ;;  %p221_p4 = scmp.lt.s32.totalorder %s18_s13, %s18_s13 }
   0x9   :  { %p217_p3 = scmp.ne.s32.totalorder %s18_s13, %s216_s21  ;;  %p222_p5 = scmp.lt.s32.totalorder %s216_s21, %s216_s21 }
   0xb   :  { %p223_p6 = por %p222_p5, %p221_p4 }
   0xd   :  { %p224_p7 = pnand %p223_p6, %p217_p3 }
   0xf   :  { %227 = shalt.err (!%p224_p7)
}
  0x10   :  { %s255_s22 = smov 256   ;;  %s256_s23 = smov 16  }
  0x11   :  { %23 = dma.hbm_to_vmem [thread:$0]  %s312_s1, 4096, %s18_s13, [#allocation4], %s255_s22, %s255_s22, %s256_s23  }
  0x12   :  { %250 = dma.done.wait [#allocation4], 4096  }
  0x13   :  { %251 = vsyncadd [#allocation4], 4294963200  ;;  %v38_v0 = vld [vmem:[#allocation3 + $0x8] sm:$0xff]  ;;  %v40_v1 = vld [vmem:[#allocation3 + $0x18] sm:$0xff]  ;;  %s257_s4 = smov [#allocation6]  }
  0x14   :  { %v37_v2 = vld [vmem:[#allocation3] sm:$0xff]  ;;  %v170_v3 = vpack.c.bf16 %v40_v1, %v38_v0  ;;  %v39_v4 = vld [vmem:[#allocation3 + $0x10] sm:$0xff]  ;;  %v42_v5 = vld [vmem:[#allocation3 + $0x28] sm:$0xff]  ;;  %s160_s5 = sshll.u32 %s257_s4, 4  ;;  %s161_s5 = int_to_ptr.vmem [resolvable:$true] %s160_s5 }
  0x15   :  { %v44_v6 = vld [vmem:[#allocation3 + $0x38] sm:$0xff]  ;;  %v172_v7 = vpack.c.bf16 %v39_v4, %v37_v2  ;;  %v41_v9 = vld [vmem:[#allocation3 + $0x20] sm:$0xff]  ;;  %v43_v10 = vld [vmem:[#allocation3 + $0x30] sm:$0xff]  ;;  %s228_s6 = scalar_lea.vmem %s161_s5, 128  ;;  %p233_p9 = scmp.lt.s32.totalorder %s161_s5, %s161_s5 }
  0x16   :  { %v174_v8 = vpack.c.bf16 %v44_v6, %v42_v5  ;;  %171 = vmatprep.subr.bf16.mxu0 %v170_v3  ;;  %v46_v11 = vld [vmem:[#allocation3 + $0x48] sm:$0xff]  ;;  %v48_v12 = vld [vmem:[#allocation3 + $0x58] sm:$0xff]  ;;  %v176_v13 = vpack.c.bf16 %v43_v10, %v41_v9  ;;  %v45_v16 = vld [vmem:[#allocation3 + $0x40] sm:$0xff]  ;;  %p229_p8 = scmp.ne.s32.totalorder %s161_s5, %s228_s6  ;;  %p234_p10 = scmp.lt.s32.totalorder %s228_s6, %s228_s6 }
  0x17   :  { %173 = vmatpush1.bf16.xpose.msra.mxu0 %v172_v7  ;;  %v178_v14 = vpack.c.bf16 %v48_v12, %v46_v11  ;;  %v36_v15 = vld [vmem:[%s311_s0 + $0x8] sm:$0xff]  ;;  %v47_v17 = vld [vmem:[#allocation3 + $0x50] sm:$0xff]  ;;  %v52_v19 = vld [vmem:[#allocation3 + $0x78] sm:$0xff] }
  0x18   :  { %175 = vmatprep.subr.bf16.mxu0 %v174_v8  ;;  %133 = vmatprep.mubr.f32.mxu0 %v36_v15  ;;  %v50_v18 = vld [vmem:[#allocation3 + $0x68] sm:$0xff]  ;;  %v180_v20 = vpack.c.bf16 %v47_v17, %v45_v16  ;;  %v49_v22 = vld [vmem:[#allocation3 + $0x60] sm:$0xff]  ;;  %v51_v23 = vld [vmem:[#allocation3 + $0x70] sm:$0xff]  ;;  %p235_p11 = por %p234_p10, %p233_p9 }
  0x19   :  { %v182_v21 = vpack.c.bf16 %v52_v19, %v50_v18  ;;  %v54_v24 = vld [vmem:[#allocation3 + $0x88] sm:$0xff]  ;;  %v56_v25 = vld [vmem:[#allocation3 + $0x98] sm:$0xff]  ;;  %v184_v26 = vpack.c.bf16 %v51_v23, %v49_v22  ;;  %v53_v28 = vld [vmem:[#allocation3 + $0x80] sm:$0xff] }
  0x1a   :  { %v186_v27 = vpack.c.bf16 %v56_v25, %v54_v24  ;;  %v55_v29 = vld [vmem:[#allocation3 + $0x90] sm:$0xff]  ;;  %v58_v30 = vld [vmem:[#allocation3 + $0xa8] sm:$0xff]  ;;  %v60_v31 = vld [vmem:[#allocation3 + $0xb8] sm:$0xff]  ;;  %p236_p12 = pnand %p235_p11, %p229_p8 }
  0x1b   :  { %v188_v32 = vpack.c.bf16 %v55_v29, %v53_v28  ;;  %v190_v33 = vpack.c.bf16 %v60_v31, %v58_v30  ;;  %v57_v34 = vld [vmem:[#allocation3 + $0xa0] sm:$0xff]  ;;  %v59_v35 = vld [vmem:[#allocation3 + $0xb0] sm:$0xff]  ;;  %v62_v36 = vld [vmem:[#allocation3 + $0xc8] sm:$0xff] }
  0x1c   :  { %v64_v37 = vld [vmem:[#allocation3 + $0xd8] sm:$0xff]  ;;  %v192_v38 = vpack.c.bf16 %v59_v35, %v57_v34  ;;  %v61_v40 = vld [vmem:[#allocation3 + $0xc0] sm:$0xff]  ;;  %v63_v41 = vld [vmem:[#allocation3 + $0xd0] sm:$0xff] }
  0x1d   :  { %v194_v39 = vpack.c.bf16 %v64_v37, %v62_v36  ;;  %v66_v42 = vld [vmem:[#allocation3 + $0xe8] sm:$0xff]  ;;  %v68_v43 = vld [vmem:[#allocation3 + $0xf8] sm:$0xff]  ;;  %v196_v44 = vpack.c.bf16 %v63_v41, %v61_v40  ;;  %v65_v46 = vld [vmem:[#allocation3 + $0xe0] sm:$0xff] }
  0x1e   :  { %v198_v45 = vpack.c.bf16 %v68_v43, %v66_v42  ;;  %v67_v47 = vld [vmem:[#allocation3 + $0xf0] sm:$0xff]  ;;  %v35_v49 = vld [vmem:[%s311_s0] sm:$0xff] }
  0x1f   :  { %177 = vmatpush1.bf16.xpose.msra.mxu0 %v176_v13  ;;  %v200_v48 = vpack.c.bf16 %v67_v47, %v65_v46  ;;  %v169_v50 = vld [vmem:[%s313_s2] ss:$0 sm:$0xff] }
  0x20   :  { %179 = vmatprep.subr.bf16.mxu0 %v178_v14 }
  0x27   :  { %181 = vmatpush1.bf16.xpose.msra.mxu0 %v180_v20 }
  0x28   :  { %183 = vmatprep.subr.bf16.mxu0 %v182_v21 }
  0x2f   :  { %185 = vmatpush1.bf16.xpose.msra.mxu0 %v184_v26 }
  0x30   :  { %187 = vmatprep.subr.bf16.mxu0 %v186_v27 }
  0x37   :  { %189 = vmatpush1.bf16.xpose.msra.mxu0 %v188_v32 }
  0x38   :  { %191 = vmatprep.subr.bf16.mxu0 %v190_v33 }
  0x3f   :  { %193 = vmatpush1.bf16.xpose.msra.mxu0 %v192_v38 }
  0x40   :  { %195 = vmatprep.subr.bf16.mxu0 %v194_v39 }
  0x47   :  { %197 = vmatpush1.bf16.xpose.msra.mxu0 %v196_v44 }
  0x48   :  { %199 = vmatprep.subr.bf16.mxu0 %v198_v45 }
  0x4f   :  { %201 = vmatpush1.bf16.xpose.msra.mxu0 %v200_v48 }
  0x56   :  { %134 = vmatmul.mubr.f32.vlgmr.msra.gmra.mrb[0].mxu0 %v35_v49 }
 0x129   :  { %v135_v51 = vpop.f32.mrb[0].mxu0 }
 0x12a   :  { %v152_v52 = vadd.f32 %v169_v50, %v135_v51  ;;  %v137_v53 = vpop.f32.mrb[1].mxu0 }
 0x12c   :  { %153 = vst [vmem:[#allocation6] sm:$0xff] %v152_v52 }
 0x12d   :  { %239 = shalt.err (!%p236_p12)
}
 0x12e   :  { %s240_s8 = scalar_lea.hbm %s314_s3, 128 }
 0x12f   :  { %p241_p13 = scmp.ne.s32.totalorder %s314_s3, %s240_s8  ;;  %p244_p0 = scmp.lt.u32.totalorder %s240_s8, %s314_s3 }
 0x131   :  { %p246_p1 = pnand %p244_p0, %p241_p13 }
 0x133   :  { %249 = shalt.err (!%p246_p1)
}
 0x134   :  { %163 = dma.vmem_to_hbm [thread:$0]  %s161_s5, 128, %s314_s3, [#allocation5]  }
 0x135   :  { %252 = dma.done.wait [#allocation5], 128  }
 0x136   :  { %253 = vsyncadd [#allocation5], 4294967168 }
 0x137   :  { %167 = vsyncpa [#allocation4], 1 }
 0x138   :  { %168 = vsyncpa [#allocation5], 1 }

</bundles_post_ra>
